<compile_context>
chip_gen: v7x
topology: tpu7x:2x2x1
jax: 0.10.0
libtpu: 0.0.40
codegen_flags: <defaults>
</compile_context>

<pallas_src>
import jax
import jax.numpy as jnp
from jax.experimental import pallas as pl
from jax.experimental.pallas import tpu as pltpu


N_FIELDS = 9  # 1 user embedding + 8 tag embeddings


# ----------------------------------------------------------------------------
# Pallas kernel: FM cross + deep MLP + final sigmoid (one batch tile per step)
# ----------------------------------------------------------------------------
def _deepfm_kernel(x_ref, s_ref, w1_ref, b1_ref, w2_ref, b2_ref,
                   w3_ref, b3_ref, out_ref):
    x = x_ref[...]                                                # (TB, 9*D) f32

    # ---- FM cross term (from the flat layout via the field-sum matrix) ----
    sum_f = jnp.dot(x, s_ref[...],
                    preferred_element_type=jnp.float32)           # (TB, D)
    sq_of_sum = jnp.sum(sum_f * sum_f, axis=-1, keepdims=True)    # (TB, 1)
    sum_of_sq = jnp.sum(x * x, axis=-1, keepdims=True)            # (TB, 1)
    fm = 0.5 * (sq_of_sum - sum_of_sq)                            # (TB, 1)

    # ---- Deep (MLP) part ---------------------------------------------------
    h1 = jnp.dot(x, w1_ref[...], preferred_element_type=jnp.float32)
    h1 = jnp.maximum(h1 + b1_ref[...], 0.0)                       # (TB, H1)
    h2 = jnp.dot(h1, w2_ref[...], preferred_element_type=jnp.float32)
    h2 = jnp.maximum(h2 + b2_ref[...], 0.0)                       # (TB, H2)
    # Final H2 -> 1 projection as a lane reduce (avoids an N=1 MXU pass).
    logit = jnp.sum(h2 * w3_ref[...], axis=-1, keepdims=True) + b3_ref[...]
    deep = jax.nn.sigmoid(logit)                                  # (TB, 1)

    # ---- Combine (PyTorch module: sigmoid(fm + sigmoid(mlp_logit))) --------
    out_ref[...] = jax.nn.sigmoid(fm + deep)                      # (TB, 1)


def _round_up(n, m):
    return ((n + m - 1) // m) * m


def deepfm_pallas(x, s_mat, w1, b1, w2, b2, w3_row, b3, *, max_batch_tile=256):
    """x: (B, 9*D) f32 flattened features. Returns (B,) click probabilities."""
    batch, k = x.shape
    d = s_mat.shape[1]
    h1 = w1.shape[1]
    h2 = w2.shape[1]

    # Batch tile: multiple of 8 sublanes, capped at 256 rows.
    tb = min(max_batch_tile, _round_up(batch, 8))
    batch_pad = _round_up(batch, tb)
    if batch_pad != batch:
        x = jnp.pad(x, ((0, batch_pad - batch), (0, 0)))
    grid = (batch_pad // tb,)

    batch_spec = pl.BlockSpec((tb, k), lambda i: (i, 0))

    def const_spec(shape):  # weights stay resident in VMEM across the grid
        return pl.BlockSpec(shape, lambda i: (0, 0))

    flops = 2 * batch_pad * (k * d + k * h1 + h1 * h2 + h2)
    bytes_accessed = 4 * (batch_pad * (k + 1) + k * d + k * h1 + h1
                          + h1 * h2 + h2 + h2 + 1)

    out = pl.pallas_call(
        _deepfm_kernel,
        grid=grid,
        in_specs=[
            batch_spec,                 # x            (TB, 9*D)
            const_spec((k, d)),         # S            (9*D, D)
            const_spec((k, h1)),        # w1
            const_spec((1, h1)),        # b1
            const_spec((h1, h2)),       # w2
            const_spec((1, h2)),        # b2
            const_spec((1, h2)),        # w3 (as a row)
            const_spec((1, 1)),         # b3
        ],
        out_specs=pl.BlockSpec((tb, 1), lambda i: (i, 0)),
        out_shape=jax.ShapeDtypeStruct((batch_pad, 1), jnp.float32),
        compiler_params=pltpu.CompilerParams(
            dimension_semantics=("parallel",),
            vmem_limit_bytes=32 * 1024 * 1024,
        ),
        cost_estimate=pl.CostEstimate(
            flops=flops,
            transcendentals=2 * batch_pad,
            bytes_accessed=bytes_accessed,
        ),
    )(x, s_mat, w1, b1, w2, b2, w3_row, b3)
    return out[:batch, 0]                                         # (B,)


# ----------------------------------------------------------------------------
# Glue: embedding lookup with max_norm=2 renorm (nn.Embedding semantics)
# ----------------------------------------------------------------------------
def _renorm(emb, max_norm=2.0):
    # PyTorch renorms rows whose L2 norm exceeds max_norm at lookup time.
    norm = jnp.linalg.norm(emb, axis=-1, keepdims=True)
    scale = jnp.where(norm > max_norm, max_norm / (norm + 1e-7), 1.0)
    return emb * scale


@jax.jit
def deepfm_forward(user_id, tag_ids, params):
    user_emb = _renorm(params["user_table"][user_id])             # (B, D)
    tags_emb = _renorm(params["tag_table"][tag_ids])              # (B, 8, D)
    feats = jnp.concatenate([user_emb[:, None, :], tags_emb], axis=1)  # (B,9,D)
    x = feats.reshape(feats.shape[0], -1).astype(jnp.float32)     # (B, 9*D)

    dim = user_emb.shape[-1]
    # Field-sum matrix: S[k, d] = 1 iff k % D == d  (stack of 9 identities).
    s_mat = jnp.tile(jnp.eye(dim, dtype=jnp.float32), (N_FIELDS, 1))

    return deepfm_pallas(
        x, s_mat,
        params["w1"], params["b1"],
        params["w2"], params["b2"],
        params["w3"].reshape(1, -1),      # (1, H2) row for the lane reduce
        params["b3"].reshape(1, 1),
    )


# ----------------------------------------------------------------------------
# Deterministic parameter init (mirrors nn.Embedding / nn.Linear defaults)
# ----------------------------------------------------------------------------
def init_params(key, n_users, n_item_tags, dim):
    k = jax.random.split(key, 8)
    mlp_in = dim * N_FIELDS
    h1 = mlp_in // 2
    h2 = mlp_in // 4

    def linear(kw, kb, fan_in, fan_out):
        bound = 1.0 / jnp.sqrt(fan_in)
        w = jax.random.uniform(kw, (fan_in, fan_out), jnp.float32, -bound, bound)
        b = jax.random.uniform(kb, (1, fan_out), jnp.float32, -bound, bound)
        return w, b

    w1, b1 = linear(k[2], k[3], mlp_in, h1)
    w2, b2 = linear(k[4], k[5], h1, h2)
    w3, b3 = linear(k[6], k[7], h2, 1)

    return {
        "user_table": jax.random.normal(k[0], (n_users, dim), jnp.float32),
        "tag_table": jax.random.normal(k[1], (n_item_tags, dim), jnp.float32),
        "w1": w1, "b1": b1,
        "w2": w2, "b2": b2,
        "w3": w3, "b3": b3,
    }


# ----------------------------------------------------------------------------
# Pure-JAX reference (exact f32 math) for a sanity check
# ----------------------------------------------------------------------------
def deepfm_ref(user_id, tag_ids, params):
    user_emb = _renorm(params["user_table"][user_id])
    tags_emb = _renorm(params["tag_table"][tag_ids])
    f = jnp.concatenate([user_emb[:, None, :], tags_emb], axis=1)
    sq_sum = jnp.sum(f, axis=1) ** 2
    sum_sq = jnp.sum(f ** 2, axis=1)
    fm = 0.5 * jnp.sum(sq_sum - sum_sq, axis=1)
    x = f.reshape(f.shape[0], -1)
    h = jax.nn.relu(x @ params["w1"] + params["b1"])
    h = jax.nn.relu(h @ params["w2"] + params["b2"])
    mlp = jax.nn.sigmoid(h @ params["w3"] + params["b3"])[:, 0]
    return jax.nn.sigmoid(fm + mlp)


if __name__ == "__main__":
    n_users, n_item_tags, dim = 50, 40, 32
    batch, n_tags_per_item = 8, 8   # 1 user + 8 tags = 9 fields -> 9*dim MLP in

    key = jax.random.PRNGKey(0)
    kp, ku, kt = jax.random.split(key, 3)
    params = init_params(kp, n_users, n_item_tags, dim)

    user_id = jax.random.randint(ku, (batch,), 0, n_users)
    tag_ids = jax.random.randint(kt, (batch, n_tags_per_item), 0, n_item_tags)

    out = jax.block_until_ready(deepfm_forward(user_id, tag_ids, params))
    ref = deepfm_ref(user_id, tag_ids, params)

    assert out.shape == (batch,)
    # Tolerance covers TPU MXU default (bf16-input) matmul precision used for
    # the in-kernel dots (incl. the FM field-sum matmul) vs. the exact-f32
    # reference; genuine bugs show up as O(0.1..1) errors on this [0,1] output.
    max_err = float(jnp.max(jnp.abs(out - ref)))
    assert max_err < 2e-2, (max_err, out, ref)

    print("KERNEL_OK")
</pallas_src>

<mosaic_0001>
module attributes {stable_mosaic.version = 11 : i64} {
  func.func @_deepfm_kernel(%arg0: i32, %arg1: memref<8x288xf32, #tpu.memory_space<vmem>>, %arg2: memref<288x32xf32, #tpu.memory_space<vmem>>, %arg3: memref<288x144xf32, #tpu.memory_space<vmem>>, %arg4: memref<1x144xf32, #tpu.memory_space<vmem>>, %arg5: memref<144x72xf32, #tpu.memory_space<vmem>>, %arg6: memref<1x72xf32, #tpu.memory_space<vmem>>, %arg7: memref<1x72xf32, #tpu.memory_space<vmem>>, %arg8: memref<1x1xf32, #tpu.memory_space<vmem>>, %arg9: memref<8x1xf32, #tpu.memory_space<vmem>>) attributes {dimension_semantics = [#tpu.dimension_semantics<parallel>], iteration_bounds = array<i64: 1>, scalar_prefetch = 0 : i64, scratch_operands = 0 : i64, tpu.core_type = #tpu.core_type<tc>, window_params = [{transform_indices = @transform_0, window_bounds = array<i64: 8, 288>}, {pipeline_mode = #tpu.pipeline_mode<synchronous>, transform_indices = @transform_1, window_bounds = array<i64: 288, 32>}, {pipeline_mode = #tpu.pipeline_mode<synchronous>, transform_indices = @transform_2, window_bounds = array<i64: 288, 144>}, {pipeline_mode = #tpu.pipeline_mode<synchronous>, transform_indices = @transform_3, window_bounds = array<i64: 1, 144>}, {pipeline_mode = #tpu.pipeline_mode<synchronous>, transform_indices = @transform_4, window_bounds = array<i64: 144, 72>}, {pipeline_mode = #tpu.pipeline_mode<synchronous>, transform_indices = @transform_5, window_bounds = array<i64: 1, 72>}, {pipeline_mode = #tpu.pipeline_mode<synchronous>, transform_indices = @transform_6, window_bounds = array<i64: 1, 72>}, {pipeline_mode = #tpu.pipeline_mode<synchronous>, transform_indices = @transform_7, window_bounds = array<i64: 1, 1>}, {transform_indices = @transform_8, window_bounds = array<i64: 8, 1>}]} {
    %c0 = arith.constant 0 : index
    %c0_0 = arith.constant 0 : index
    %0 = vector.load %arg1[%c0, %c0_0] : memref<8x288xf32, #tpu.memory_space<vmem>>, vector<8x288xf32>
    %c0_1 = arith.constant 0 : index
    %c0_2 = arith.constant 0 : index
    %1 = vector.load %arg2[%c0_1, %c0_2] : memref<288x32xf32, #tpu.memory_space<vmem>>, vector<288x32xf32>
    %cst = arith.constant dense<0.000000e+00> : vector<8x32xf32>
    %2 = tpu.matmul %0, %1, %cst {dimension_numbers = #tpu.dot_dimension_numbers<[1], [0], [0], [1], [0, 0, 1, 1], [], []>} : vector<8x288xf32>, vector<288x32xf32>, vector<8x32xf32> -> vector<8x32xf32>
    %3 = arith.mulf %2, %2 : vector<8x32xf32>
    %cst_3 = arith.constant dense<0.000000e+00> : vector<8xf32>
    %4 = vector.multi_reduction <add>, %3, %cst_3 [1] : vector<8x32xf32> to vector<8xf32>
    %5 = vector.shape_cast %4 : vector<8xf32> to vector<8x1xf32>
    %6 = arith.mulf %0, %0 : vector<8x288xf32>
    %cst_4 = arith.constant dense<0.000000e+00> : vector<8xf32>
    %7 = vector.multi_reduction <add>, %6, %cst_4 [1] : vector<8x288xf32> to vector<8xf32>
    %8 = vector.shape_cast %7 : vector<8xf32> to vector<8x1xf32>
    %9 = arith.subf %5, %8 : vector<8x1xf32>
    %cst_5 = arith.constant 5.000000e-01 : f32
    %10 = vector.broadcast %cst_5 : f32 to vector<8x1xf32>
    %11 = arith.mulf %10, %9 : vector<8x1xf32>
    %c0_6 = arith.constant 0 : index
    %c0_7 = arith.constant 0 : index
    %12 = vector.load %arg3[%c0_6, %c0_7] : memref<288x144xf32, #tpu.memory_space<vmem>>, vector<288x144xf32>
    %cst_8 = arith.constant dense<0.000000e+00> : vector<8x144xf32>
    %13 = tpu.matmul %0, %12, %cst_8 {dimension_numbers = #tpu.dot_dimension_numbers<[1], [0], [0], [1], [0, 0, 1, 1], [], []>} : vector<8x288xf32>, vector<288x144xf32>, vector<8x144xf32> -> vector<8x144xf32>
    %c0_9 = arith.constant 0 : index
    %c0_10 = arith.constant 0 : index
    %14 = vector.load %arg4[%c0_9, %c0_10] : memref<1x144xf32, #tpu.memory_space<vmem>>, vector<1x144xf32>
    %15 = vector.broadcast %14 : vector<1x144xf32> to vector<8x144xf32>
    %16 = arith.addf %13, %15 : vector<8x144xf32>
    %cst_11 = arith.constant 0.000000e+00 : f32
    %17 = vector.broadcast %cst_11 : f32 to vector<8x144xf32>
    %18 = arith.maximumf %16, %17 : vector<8x144xf32>
    %c0_12 = arith.constant 0 : index
    %c0_13 = arith.constant 0 : index
    %19 = vector.load %arg5[%c0_12, %c0_13] : memref<144x72xf32, #tpu.memory_space<vmem>>, vector<144x72xf32>
    %cst_14 = arith.constant dense<0.000000e+00> : vector<8x72xf32>
    %20 = tpu.matmul %18, %19, %cst_14 {dimension_numbers = #tpu.dot_dimension_numbers<[1], [0], [0], [1], [0, 0, 1, 1], [], []>} : vector<8x144xf32>, vector<144x72xf32>, vector<8x72xf32> -> vector<8x72xf32>
    %c0_15 = arith.constant 0 : index
    %c0_16 = arith.constant 0 : index
    %21 = vector.load %arg6[%c0_15, %c0_16] : memref<1x72xf32, #tpu.memory_space<vmem>>, vector<1x72xf32>
    %22 = vector.broadcast %21 : vector<1x72xf32> to vector<8x72xf32>
    %23 = arith.addf %20, %22 : vector<8x72xf32>
    %cst_17 = arith.constant 0.000000e+00 : f32
    %24 = vector.broadcast %cst_17 : f32 to vector<8x72xf32>
    %25 = arith.maximumf %23, %24 : vector<8x72xf32>
    %c0_18 = arith.constant 0 : index
    %c0_19 = arith.constant 0 : index
    %26 = vector.load %arg7[%c0_18, %c0_19] : memref<1x72xf32, #tpu.memory_space<vmem>>, vector<1x72xf32>
    %27 = vector.broadcast %26 : vector<1x72xf32> to vector<8x72xf32>
    %28 = arith.mulf %25, %27 : vector<8x72xf32>
    %cst_20 = arith.constant dense<0.000000e+00> : vector<8xf32>
    %29 = vector.multi_reduction <add>, %28, %cst_20 [1] : vector<8x72xf32> to vector<8xf32>
    %30 = vector.shape_cast %29 : vector<8xf32> to vector<8x1xf32>
    %c0_21 = arith.constant 0 : index
    %c0_22 = arith.constant 0 : index
    %31 = vector.load %arg8[%c0_21, %c0_22] : memref<1x1xf32, #tpu.memory_space<vmem>>, vector<1x1xf32>
    %32 = vector.broadcast %31 : vector<1x1xf32> to vector<8x1xf32>
    %33 = arith.addf %30, %32 : vector<8x1xf32>
    %34 = arith.negf %33 : vector<8x1xf32>
    %35 = math.exp %34 : vector<8x1xf32>
    %cst_23 = arith.constant 1.000000e+00 : f32
    %36 = vector.broadcast %cst_23 : f32 to vector<8x1xf32>
    %37 = arith.addf %36, %35 : vector<8x1xf32>
    %38 = arith.divf %36, %37 : vector<8x1xf32>
    %39 = arith.addf %11, %38 : vector<8x1xf32>
    %40 = arith.negf %39 : vector<8x1xf32>
    %41 = math.exp %40 : vector<8x1xf32>
    %cst_24 = arith.constant 1.000000e+00 : f32
    %42 = vector.broadcast %cst_24 : f32 to vector<8x1xf32>
    %43 = arith.addf %42, %41 : vector<8x1xf32>
    %44 = arith.divf %42, %43 : vector<8x1xf32>
    %c0_25 = arith.constant 0 : index
    %c0_26 = arith.constant 0 : index
    %45 = vector.load %arg9[%c0_25, %c0_26] : memref<8x1xf32, #tpu.memory_space<vmem>>, vector<8x1xf32>
    tpu.vector_store %arg9[%c0_25, %c0_26], %44 {strides = array<i32>} : memref<8x1xf32, #tpu.memory_space<vmem>>, vector<8x1xf32>,
    return
  }
  func.func @transform_0(%arg0: i32) -> (i32, i32) {
    %c0_i32 = arith.constant 0 : i32
    %c0_i32_0 = arith.constant 0 : i32
    return %arg0, %c0_i32 : i32, i32
  }
  func.func @transform_1(%arg0: i32) -> (i32, i32) {
    %c0_i32 = arith.constant 0 : i32
    %c0_i32_0 = arith.constant 0 : i32
    %c0_i32_1 = arith.constant 0 : i32
    return %c0_i32, %c0_i32_0 : i32, i32
  }
  func.func @transform_2(%arg0: i32) -> (i32, i32) {
    %c0_i32 = arith.constant 0 : i32
    %c0_i32_0 = arith.constant 0 : i32
    %c0_i32_1 = arith.constant 0 : i32
    return %c0_i32, %c0_i32_0 : i32, i32
  }
  func.func @transform_3(%arg0: i32) -> (i32, i32) {
    %c0_i32 = arith.constant 0 : i32
    %c0_i32_0 = arith.constant 0 : i32
    %c0_i32_1 = arith.constant 0 : i32
    return %c0_i32, %c0_i32_0 : i32, i32
  }
  func.func @transform_4(%arg0: i32) -> (i32, i32) {
    %c0_i32 = arith.constant 0 : i32
    %c0_i32_0 = arith.constant 0 : i32
    %c0_i32_1 = arith.constant 0 : i32
    return %c0_i32, %c0_i32_0 : i32, i32
  }
  func.func @transform_5(%arg0: i32) -> (i32, i32) {
    %c0_i32 = arith.constant 0 : i32
    %c0_i32_0 = arith.constant 0 : i32
    %c0_i32_1 = arith.constant 0 : i32
    return %c0_i32, %c0_i32_0 : i32, i32
  }
  func.func @transform_6(%arg0: i32) -> (i32, i32) {
    %c0_i32 = arith.constant 0 : i32
    %c0_i32_0 = arith.constant 0 : i32
    %c0_i32_1 = arith.constant 0 : i32
    return %c0_i32, %c0_i32_0 : i32, i32
  }
  func.func @transform_7(%arg0: i32) -> (i32, i32) {
    %c0_i32 = arith.constant 0 : i32
    %c0_i32_0 = arith.constant 0 : i32
    %c0_i32_1 = arith.constant 0 : i32
    return %c0_i32, %c0_i32_0 : i32, i32
  }
  func.func @transform_8(%arg0: i32) -> (i32, i32) {
    %c0_i32 = arith.constant 0 : i32
    %c0_i32_0 = arith.constant 0 : i32
    return %arg0, %c0_i32 : i32, i32
  }
}

</mosaic_0001>

<bundles_post_ra>
// kernel: deepfm_forward.1
= control target key start
LH: loop header
LB: loop body
LE: loop exit
PB: predicated region body
PF: predicated region fallthrough
CT: control target
= control target key end

     0   :  { %vm807_vm0 = vmmov 0   ;;  %vm70_vm1 = vcmask 261120   ;;  %vm481_vm2 = vcmask 130048   ;;  %vm564_vm3 = vcmask 588800   ;;  %s1289_s2 = inlined_call_operand.vmem [shape: f32[288,144], index: 2, kind: input, shape index: {}]   ;;  %s1290_s0 = inlined_call_operand.vmem [shape: f32[8,288], index: 0, kind: input, shape index: {}]   ;;  %s1291_s1 = inlined_call_operand.vmem [shape: f32[288,32], index: 1, kind: input, shape index: {}]   ;;  %s1292_s4 = inlined_call_operand.vmem [shape: f32[144,72], index: 4, kind: input, shape index: {}]   ;;  %s1293_s3 = inlined_call_operand.vmem [shape: f32[1,144], index: 3, kind: input, shape index: {}]   ;;  %s1294_s7 = inlined_call_operand.<no memory space> [shape: f32[1,1], index: 7, kind: input, shape index: {}]   ;;  %s1295_s5 = inlined_call_operand.vmem [shape: f32[1,72], index: 5, kind: input, shape index: {}]   ;;  %s1296_s6 = inlined_call_operand.vmem [shape: f32[1,72], index: 6, kind: input, shape index: {}]   ;;  %s1297_s8 = inlined_call_operand.vmem [shape: f32[8,1], index: 8, kind: output, shape index: {}]  }
   0x1   :  { %v229_v0 = vld [vmem:[%s1289_s2 + $0x8] sm:$0xff]  ;;  %v231_v1 = vld [vmem:[%s1289_s2 + $0x18] sm:$0xff]  ;;  %v228_v2 = vld [vmem:[%s1289_s2] sm:$0xff]  ;;  %vm589_vm4 = vcmask 7168  }
   0x2   :  { %v692_v3 = vpack.c.bf16 %v231_v1, %v229_v0  ;;  %v230_v4 = vld [vmem:[%s1289_s2 + $0x10] sm:$0xff]  ;;  %v233_v5 = vld [vmem:[%s1289_s2 + $0x28] sm:$0xff]  ;;  %v235_v6 = vld [vmem:[%s1289_s2 + $0x38] sm:$0xff] }
   0x3   :  { %v694_v7 = vpack.c.bf16 %v230_v4, %v228_v2  ;;  %v696_v8 = vpack.c.bf16 %v235_v6, %v233_v5  ;;  %v232_v9 = vld [vmem:[%s1289_s2 + $0x20] sm:$0xff]  ;;  %v234_v10 = vld [vmem:[%s1289_s2 + $0x30] sm:$0xff]  ;;  %v237_v11 = vld [vmem:[%s1289_s2 + $0x48] sm:$0xff] }
   0x4   :  { %693 = vmatprep.subr.bf16.mxu1 %v692_v3  ;;  %v239_v12 = vld [vmem:[%s1289_s2 + $0x58] sm:$0xff]  ;;  %v698_v13 = vpack.c.bf16 %v234_v10, %v232_v9  ;;  %v236_v15 = vld [vmem:[%s1289_s2 + $0x40] sm:$0xff]  ;;  %v238_v16 = vld [vmem:[%s1289_s2 + $0x50] sm:$0xff] }
   0x5   :  { %695 = vmatpush1.bf16.msra.mxu1 %v694_v7  ;;  %v700_v14 = vpack.c.bf16 %v239_v12, %v237_v11  ;;  %v241_v17 = vld [vmem:[%s1289_s2 + $0x68] sm:$0xff]  ;;  %v243_v18 = vld [vmem:[%s1289_s2 + $0x78] sm:$0xff]  ;;  %v702_v19 = vpack.c.bf16 %v238_v16, %v236_v15  ;;  %v240_v21 = vld [vmem:[%s1289_s2 + $0x60] sm:$0xff] }
   0x6   :  { %697 = vmatprep.subr.bf16.mxu1 %v696_v8  ;;  %v704_v20 = vpack.c.bf16 %v243_v18, %v241_v17  ;;  %v242_v22 = vld [vmem:[%s1289_s2 + $0x70] sm:$0xff]  ;;  %v245_v23 = vld [vmem:[%s1289_s2 + $0x88] sm:$0xff]  ;;  %v247_v24 = vld [vmem:[%s1289_s2 + $0x98] sm:$0xff] }
   0x7   :  { %v706_v25 = vpack.c.bf16 %v242_v22, %v240_v21  ;;  %v708_v26 = vpack.c.bf16 %v247_v24, %v245_v23  ;;  %v244_v27 = vld [vmem:[%s1289_s2 + $0x80] sm:$0xff]  ;;  %v246_v28 = vld [vmem:[%s1289_s2 + $0x90] sm:$0xff]  ;;  %v249_v29 = vld [vmem:[%s1289_s2 + $0xa8] sm:$0xff] }
   0x8   :  { %v251_v30 = vld [vmem:[%s1289_s2 + $0xb8] sm:$0xff]  ;;  %v710_v31 = vpack.c.bf16 %v246_v28, %v244_v27  ;;  %v248_v33 = vld [vmem:[%s1289_s2 + $0xa0] sm:$0xff]  ;;  %v250_v34 = vld [vmem:[%s1289_s2 + $0xb0] sm:$0xff] }
   0x9   :  { %699 = vmatpush1.bf16.msra.mxu1 %v698_v13  ;;  %v712_v32 = vpack.c.bf16 %v251_v30, %v249_v29  ;;  %v253_v35 = vld [vmem:[%s1289_s2 + $0xc8] sm:$0xff]  ;;  %v255_v36 = vld [vmem:[%s1289_s2 + $0xd8] sm:$0xff]  ;;  %v714_v37 = vpack.c.bf16 %v250_v34, %v248_v33  ;;  %v252_v39 = vld [vmem:[%s1289_s2 + $0xc0] sm:$0xff] }
   0xa   :  { %701 = vmatprep.subr.bf16.mxu1 %v700_v14  ;;  %v716_v38 = vpack.c.bf16 %v255_v36, %v253_v35  ;;  %v254_v40 = vld [vmem:[%s1289_s2 + $0xd0] sm:$0xff]  ;;  %v941_v41 = vld [vmem:[%s1290_s0 + $0x8] sm:$0xff]  ;;  %v259_v43 = vld [vmem:[%s1289_s2 + $0xf8] sm:$0xff] }
   0xb   :  { %v257_v42 = vld [vmem:[%s1289_s2 + $0xe8] sm:$0xff]  ;;  %376 = vmatprep.mubr.f32.mxu1 %v941_v41  ;;  %138 = vmatprep.mubr.f32.mxu0 %v941_v41  ;;  %v256_v44 = vld [vmem:[%s1289_s2 + $0xe0] sm:$0xff]  ;;  %v718_v45 = vpack.c.bf16 %v254_v40, %v252_v39  ;;  %v258_v46 = vld [vmem:[%s1289_s2 + $0xf0] sm:$0xff] }
   0xc   :  { %v261_v47 = vld [vmem:[%s1289_s2 + $0x108] sm:$0xff]  ;;  %v263_v48 = vld [vmem:[%s1289_s2 + $0x118] sm:$0xff]  ;;  %v720_v49 = vpack.c.bf16 %v259_v43, %v257_v42  ;;  %v50_v50 = vld [vmem:[%s1291_s1 + $0x80] sm:$0xff]  ;;  %v722_v62 = vpack.c.bf16 %v258_v46, %v256_v44 }
   0xd   :  { %703 = vmatpush1.bf16.msra.mxu1 %v702_v19  ;;  %v51_v51 = vld [vmem:[%s1291_s1 + $0x88] sm:$0xff]  ;;  %v34_v52 = vld [vmem:[%s1291_s1] sm:$0xff]  ;;  %v52_v55 = vld [vmem:[%s1291_s1 + $0x90] sm:$0xff]  ;;  %v724_v0 = vpack.c.bf16 %v263_v48, %v261_v47 }
   0xe   :  { %705 = vmatprep.subr.bf16.mxu1 %v704_v20  ;;  %v654_v53 = vpack.c.bf16 %v51_v51, %v50_v50  ;;  %v35_v54 = vld [vmem:[%s1291_s1 + $0x8] sm:$0xff]  ;;  %v53_v56 = vld [vmem:[%s1291_s1 + $0x98] sm:$0xff]  ;;  %v36_v59 = vld [vmem:[%s1291_s1 + $0x10] sm:$0xff] }
   0xf   :  { %v656_v57 = vpack.c.bf16 %v35_v54, %v34_v52  ;;  %v658_v58 = vpack.c.bf16 %v53_v56, %v52_v55  ;;  %v37_v60 = vld [vmem:[%s1291_s1 + $0x18] sm:$0xff]  ;;  %v54_v61 = vld [vmem:[%s1291_s1 + $0xa0] sm:$0xff]  ;;  %v55_v63 = vld [vmem:[%s1291_s1 + $0xa8] sm:$0xff] }
  0x10   :  { %655 = vmatprep.subr.bf16.mxu0 %v654_v53  ;;  %v260_v1 = vld [vmem:[%s1289_s2 + $0x100] sm:$0xff]  ;;  %v262_v2 = vld [vmem:[%s1289_s2 + $0x110] sm:$0xff]  ;;  %v265_v3 = vld [vmem:[%s1289_s2 + $0x128] sm:$0xff]  ;;  %v660_v4 = vpack.c.bf16 %v37_v60, %v36_v59  ;;  %v662_v6 = vpack.c.bf16 %v55_v63, %v54_v61 }
  0x11   :  { %707 = vmatpush1.bf16.msra.mxu1 %v706_v25  ;;  %657 = vmatpush3.bf16.msra.mxu0 %v656_v57  ;;  %v267_v5 = vld [vmem:[%s1289_s2 + $0x138] sm:$0xff]  ;;  %v38_v7 = vld [vmem:[%s1291_s1 + $0x20] sm:$0xff]  ;;  %v39_v8 = vld [vmem:[%s1291_s1 + $0x28] sm:$0xff]  ;;  %v726_v11 = vpack.c.bf16 %v262_v2, %v260_v1 }
  0x12   :  { %709 = vmatprep.subr.bf16.mxu1 %v708_v26  ;;  %659 = vmatprep.subr.bf16.mxu0 %v658_v58  ;;  %v56_v9 = vld [vmem:[%s1291_s1 + $0xb0] sm:$0xff]  ;;  %v57_v10 = vld [vmem:[%s1291_s1 + $0xb8] sm:$0xff]  ;;  %v728_v12 = vpack.c.bf16 %v267_v5, %v265_v3  ;;  %v264_v13 = vld [vmem:[%s1289_s2 + $0x120] sm:$0xff]  ;;  %v664_v16 = vpack.c.bf16 %v39_v8, %v38_v7 }
  0x13   :  { %v266_v14 = vld [vmem:[%s1289_s2 + $0x130] sm:$0xff]  ;;  %v269_v15 = vld [vmem:[%s1289_s2 + $0x148] sm:$0xff]  ;;  %v271_v17 = vld [vmem:[%s1289_s2 + $0x158] sm:$0xff]  ;;  %v666_v18 = vpack.c.bf16 %v57_v10, %v56_v9 }
  0x14   :  { %v40_v19 = vld [vmem:[%s1291_s1 + $0x30] sm:$0xff]  ;;  %v41_v20 = vld [vmem:[%s1291_s1 + $0x38] sm:$0xff]  ;;  %v58_v21 = vld [vmem:[%s1291_s1 + $0xc0] sm:$0xff]  ;;  %v730_v23 = vpack.c.bf16 %v266_v14, %v264_v13  ;;  %v732_v24 = vpack.c.bf16 %v271_v17, %v269_v15 }
  0x15   :  { %711 = vmatpush1.bf16.msra.mxu1 %v710_v31  ;;  %661 = vmatpush3.bf16.msra.mxu0 %v660_v4  ;;  %v59_v22 = vld [vmem:[%s1291_s1 + $0xc8] sm:$0xff]  ;;  %v268_v25 = vld [vmem:[%s1289_s2 + $0x140] sm:$0xff]  ;;  %v270_v26 = vld [vmem:[%s1289_s2 + $0x150] sm:$0xff]  ;;  %v668_v28 = vpack.c.bf16 %v41_v20, %v40_v19 }
  0x16   :  { %713 = vmatprep.subr.bf16.mxu1 %v712_v32  ;;  %663 = vmatprep.subr.bf16.mxu0 %v662_v6  ;;  %v273_v27 = vld [vmem:[%s1289_s2 + $0x168] sm:$0xff]  ;;  %v275_v29 = vld [vmem:[%s1289_s2 + $0x178] sm:$0xff]  ;;  %v670_v30 = vpack.c.bf16 %v59_v22, %v58_v21  ;;  %v42_v31 = vld [vmem:[%s1291_s1 + $0x40] sm:$0xff]  ;;  %v734_v35 = vpack.c.bf16 %v270_v26, %v268_v25  ;;  %v806_v22 = vmov 0.0|0.0  }
  0x17   :  { %v43_v32 = vld [vmem:[%s1291_s1 + $0x48] sm:$0xff]  ;;  %v60_v33 = vld [vmem:[%s1291_s1 + $0xd0] sm:$0xff]  ;;  %v61_v34 = vld [vmem:[%s1291_s1 + $0xd8] sm:$0xff]  ;;  %v736_v36 = vpack.c.bf16 %v275_v29, %v273_v27 }
  0x18   :  { %v277_v39 = vld [vmem:[%s1289_s2 + $0x188] sm:$0xff]  ;;  %v672_v40 = vpack.c.bf16 %v43_v32, %v42_v31  ;;  %v279_v42 = vld [vmem:[%s1289_s2 + $0x198] sm:$0xff]  ;;  %v674_v43 = vpack.c.bf16 %v61_v34, %v60_v33  ;;  %v44_v44 = vld [vmem:[%s1291_s1 + $0x50] sm:$0xff]  ;;  %v808_v33 = vmov 0.0  }
  0x19   :  { %715 = vmatpush1.bf16.msra.mxu1 %v714_v37  ;;  %665 = vmatpush3.bf16.msra.mxu0 %v664_v16  ;;  %v272_v37 = vld [vmem:[%s1289_s2 + $0x160] sm:$0xff]  ;;  %v63_v47 = vld [vmem:[%s1291_s1 + $0xe8] sm:$0xff]  ;;  %v278_v51 = vld [vmem:[%s1289_s2 + $0x190] sm:$0xff] }
  0x1a   :  { %717 = vmatprep.subr.bf16.mxu1 %v716_v38  ;;  %667 = vmatprep.subr.bf16.mxu0 %v666_v18  ;;  %v274_v38 = vld [vmem:[%s1289_s2 + $0x170] sm:$0xff]  ;;  %v62_v46 = vld [vmem:[%s1291_s1 + $0xe0] sm:$0xff]  ;;  %v281_v52 = vld [vmem:[%s1289_s2 + $0x1a8] sm:$0xff] }
  0x1b   :  { %v738_v48 = vpack.c.bf16 %v274_v38, %v272_v37  ;;  %v276_v50 = vld [vmem:[%s1289_s2 + $0x180] sm:$0xff]  ;;  %v283_v54 = vld [vmem:[%s1289_s2 + $0x1b8] sm:$0xff]  ;;  %v678_v55 = vpack.c.bf16 %v63_v47, %v62_v46  ;;  %v47_v57 = vld [vmem:[%s1291_s1 + $0x68] sm:$0xff] }
  0x1c   :  { %v46_v56 = vld [vmem:[%s1291_s1 + $0x60] sm:$0xff]  ;;  %v64_v58 = vld [vmem:[%s1291_s1 + $0xf0] sm:$0xff]  ;;  %v65_v59 = vld [vmem:[%s1291_s1 + $0xf8] sm:$0xff]  ;;  %v742_v60 = vpack.c.bf16 %v278_v51, %v276_v50  ;;  %v744_v61 = vpack.c.bf16 %v283_v54, %v281_v52 }
  0x1d   :  { %719 = vmatpush1.bf16.msra.mxu1 %v718_v45  ;;  %669 = vmatpush3.bf16.msra.mxu0 %v668_v28  ;;  %v45_v45 = vld [vmem:[%s1291_s1 + $0x58] sm:$0xff]  ;;  %v282_v63 = vld [vmem:[%s1289_s2 + $0x1b0] sm:$0xff]  ;;  %v680_v1 = vpack.c.bf16 %v47_v57, %v46_v56  ;;  %v682_v3 = vpack.c.bf16 %v65_v59, %v64_v58  ;;  %v284_v8 = vld [vmem:[%s1289_s2 + $0x1c0] sm:$0xff] }
  0x1e   :  { %721 = vmatprep.subr.bf16.mxu1 %v720_v49  ;;  %671 = vmatprep.subr.bf16.mxu0 %v670_v30  ;;  %v740_v49 = vpack.c.bf16 %v279_v42, %v277_v39  ;;  %v676_v53 = vpack.c.bf16 %v45_v45, %v44_v44  ;;  %v287_v2 = vld [vmem:[%s1289_s2 + $0x1d8] sm:$0xff]  ;;  %v48_v4 = vld [vmem:[%s1291_s1 + $0x70] sm:$0xff]  ;;  %v289_v10 = vld [vmem:[%s1289_s2 + $0x1e8] sm:$0xff] }
  0x1f   :  { %v49_v5 = vld [vmem:[%s1291_s1 + $0x78] sm:$0xff]  ;;  %v286_v9 = vld [vmem:[%s1289_s2 + $0x1d0] sm:$0xff]  ;;  %v66_v13 = vld [vmem:[%s1291_s1 + $0x100] sm:$0xff] }
  0x20   :  { %v67_v14 = vld [vmem:[%s1291_s1 + $0x108] sm:$0xff]  ;;  %v750_v15 = vpack.c.bf16 %v286_v9, %v284_v8  ;;  %v288_v17 = vld [vmem:[%s1289_s2 + $0x1e0] sm:$0xff]  ;;  %v290_v18 = vld [vmem:[%s1289_s2 + $0x1f0] sm:$0xff] }
  0x21   :  { %723 = vmatpush1.bf16.msra.mxu1 %v722_v62  ;;  %673 = vmatpush3.bf16.msra.mxu0 %v672_v40  ;;  %v280_v62 = vld [vmem:[%s1289_s2 + $0x1a0] sm:$0xff]  ;;  %v293_v19 = vld [vmem:[%s1289_s2 + $0x208] sm:$0xff]  ;;  %v687_v20 = vpack.c.bf16 %v67_v14, %v66_v13  ;;  %v295_v21 = vld [vmem:[%s1289_s2 + $0x218] sm:$0xff]  ;;  %v754_v26 = vpack.c.bf16 %v290_v18, %v288_v17 }
  0x22   :  { %725 = vmatprep.subr.bf16.mxu1 %v724_v0  ;;  %675 = vmatprep.subr.bf16.mxu0 %v674_v43  ;;  %v285_v0 = vld [vmem:[%s1289_s2 + $0x1c8] sm:$0xff]  ;;  %v746_v6 = vpack.c.bf16 %v282_v63, %v280_v62  ;;  %v1171_v25 = vld [vmem:[%s1290_s0] sm:$0xff]  ;;  %v756_v27 = vpack.c.bf16 %v295_v21, %v293_v19  ;;  %v294_v29 = vld [vmem:[%s1289_s2 + $0x210] sm:$0xff] }
  0x23   :  { %v748_v7 = vpack.c.bf16 %v287_v2, %v285_v0  ;;  %v292_v28 = vld [vmem:[%s1289_s2 + $0x200] sm:$0xff]  ;;  %v297_v31 = vld [vmem:[%s1289_s2 + $0x228] sm:$0xff]  ;;  %v299_v32 = vld [vmem:[%s1289_s2 + $0x238] sm:$0xff] }
  0x24   :  { %v456_v34 = vld [vmem:[%s1292_s4] sm:$0xff]  ;;  %v760_v37 = vpack.c.bf16 %v299_v32, %v297_v31  ;;  %v298_v39 = vld [vmem:[%s1289_s2 + $0x230] sm:$0xff]  ;;  %v459_v43 = vld [vmem:[%s1292_s4 + $0x18] sm:$0xff] }
  0x25   :  { %727 = vmatpush1.bf16.msra.mxu1 %v726_v11  ;;  %677 = vmatpush3.bf16.msra.mxu0 %v676_v53  ;;  %v684_v11 = vpack.c.bf16 %v49_v5, %v48_v4  ;;  %v296_v38 = vld [vmem:[%s1289_s2 + $0x220] sm:$0xff]  ;;  %v458_v42 = vld [vmem:[%s1292_s4 + $0x10] sm:$0xff]  ;;  %v463_v51 = vld [vmem:[%s1292_s4 + $0x38] sm:$0xff]  ;;  %v302_v4 = vlaneseq }
  0x26   :  { %729 = vmatprep.subr.bf16.mxu1 %v728_v12  ;;  %679 = vmatprep.subr.bf16.mxu0 %v678_v55  ;;  %v291_v12 = vld [vmem:[%s1289_s2 + $0x1f8] sm:$0xff]  ;;  %v762_v44 = vpack.c.bf16 %v298_v39, %v296_v38  ;;  %v1210_v45 = vld [vmem:[%s1290_s0 + $0x10] sm:$0xff]  ;;  %v768_v46 = vpack.c.bf16 %v459_v43, %v458_v42  ;;  %v460_v47 = vld [vmem:[%s1292_s4 + $0x20] sm:$0xff] }
  0x27   :  { %v752_v16 = vpack.c.bf16 %v291_v12, %v289_v10  ;;  %v462_v50 = vld [vmem:[%s1292_s4 + $0x30] sm:$0xff]  ;;  %v464_v53 = vld [vmem:[%s1292_s4 + $0x40] sm:$0xff]  ;;  %v465_v54 = vld [vmem:[%s1292_s4 + $0x48] sm:$0xff]  ;;  %v303_v8 = vshrl.u32 %v302_v4, 7 }
  0x28   :  { %v774_v52 = vpack.c.bf16 %v463_v51, %v462_v50  ;;  %v777_v55 = vpack.c.bf16 %v465_v54, %v464_v53  ;;  %v466_v56 = vld [vmem:[%s1292_s4 + $0x50] sm:$0xff]  ;;  %v467_v57 = vld [vmem:[%s1292_s4 + $0x58] sm:$0xff]  ;;  %v468_v59 = vld [vmem:[%s1292_s4 + $0x60] sm:$0xff] }
  0x29   :  { %731 = vmatpush1.bf16.msra.mxu1 %v730_v23  ;;  %681 = vmatpush3.bf16.msra.mxu0 %v680_v1  ;;  %v68_v23 = vld [vmem:[%s1291_s1 + $0x110] sm:$0xff]  ;;  %v780_v58 = vpack.c.bf16 %v467_v57, %v466_v56  ;;  %v471_v63 = vld [vmem:[%s1292_s4 + $0x78] sm:$0xff]  ;;  %v472_v1 = vld [vmem:[%s1292_s4 + $0x80] sm:$0xff]  ;;  %v304_v9 = vsub.s32 0, %v303_v8 }
  0x2a   :  { %733 = vmatprep.subr.bf16.mxu1 %v732_v24  ;;  %683 = vmatprep.subr.bf16.mxu0 %v682_v3  ;;  %v69_v24 = vld [vmem:[%s1291_s1 + $0x118] sm:$0xff]  ;;  %v470_v62 = vld [vmem:[%s1292_s4 + $0x70] sm:$0xff]  ;;  %v473_v2 = vld [vmem:[%s1292_s4 + $0x88] sm:$0xff] }
  0x2b   :  { %v690_v30 = vpack.c.bf16 %v69_v24, %v68_v23  ;;  %v786_v0 = vpack.c.bf16 %v471_v63, %v470_v62  ;;  %v789_v3 = vpack.c.bf16 %v473_v2, %v472_v1  ;;  %v300_v10 = vld [vmem:[%s1293_s3] sm:$0x3]  ;;  %v218_v23 = vmul.f32 %v1171_v25, %v1171_v25 }
  0x2c   :  { %v219_v24 = vmul.f32 %v941_v41, %v941_v41 }
  0x2d   :  { %735 = vmatpush1.bf16.msra.mxu1 %v734_v35  ;;  %685 = vmatpush3.bf16.msra.mxu0 %v684_v11  ;;  %v457_v35 = vld [vmem:[%s1292_s4 + $0x8] sm:$0xff]  ;;  %v308_v11 = vsub.s32 1, %v303_v8 }
  0x2e   :  { %737 = vmatprep.subr.bf16.mxu1 %v736_v36  ;;  %686 = vmatprep.subr.bf16.mxu0 %v806_v22  ;;  %v758_v36 = vpack.c.bf16 %v294_v29, %v292_v28  ;;  %v765_v40 = vpack.c.bf16 %v457_v35, %v456_v34 }
  0x30   :  { %139 = vmatmul.mubr.f32.vlgmr.msra.gmra.mrb[0].mxu0 %v1171_v25 }
  0x31   :  { %739 = vmatpush1.bf16.msra.mxu1 %v738_v48  ;;  %688 = vmatpush3.bf16.msra.mxu0 %v687_v20  ;;  %v461_v48 = vld [vmem:[%s1292_s4 + $0x28] sm:$0xff] }
  0x32   :  { %741 = vmatprep.subr.bf16.mxu1 %v740_v49  ;;  %689 = vmatprep.subr.bf16.mxu0 %v806_v22  ;;  %v771_v49 = vpack.c.bf16 %v461_v48, %v460_v47 }
  0x33   :  { %651 = vmatprep.mubr.msk.f32.mxu0 %vm807_vm0, %v808_v33 }
  0x35   :  { %743 = vmatpush1.bf16.msra.mxu1 %v742_v60  ;;  %691 = vmatpush3.bf16.msra.mxu0 %v690_v30  ;;  %v469_v60 = vld [vmem:[%s1292_s4 + $0x68] sm:$0xff]  ;;  %v13_v30 = vstv %s1294_s7 }
  0x36   :  { %745 = vmatprep.subr.bf16.mxu1 %v744_v61  ;;  %764 = vmatprep.subr.bf16.mxu0 %v806_v22  ;;  %v783_v61 = vpack.c.bf16 %v469_v60, %v468_v59  ;;  %14 = vst [vmem:[#allocation2] sm:$0x1] %v13_v30 }
  0x38   :  { %652 = vmatmul.mubr.msk.f32.vlgmr.msra.gmra.mrb[2].mxu0 %vm70_vm1, %v1210_v45 }
  0x39   :  { %747 = vmatpush1.bf16.msra.mxu1 %v746_v6  ;;  %766 = vmatpush1.bf16.msra.mxu0 %v765_v40 }
  0x3a   :  { %749 = vmatprep.subr.bf16.mxu1 %v748_v7  ;;  %767 = vmatprep.subr.bf16.mxu0 %v806_v22 }
  0x3d   :  { %751 = vmatpush1.bf16.msra.mxu1 %v750_v15  ;;  %769 = vmatpush1.bf16.msra.mxu0 %v768_v46  ;;  %v305_v15 = vrot.slane %v300_v10, %v304_v9  ;;  %v600_v39 = vld [vmem:[#allocation2] ss:$0 sm:$0xff] }
  0x3e   :  { %753 = vmatprep.subr.bf16.mxu1 %v752_v16  ;;  %770 = vmatprep.subr.bf16.mxu0 %v806_v22  ;;  %v309_v16 = vrot.slane %v300_v10, %v308_v11 }
  0x41   :  { %755 = vmatpush1.bf16.msra.mxu1 %v754_v26  ;;  %772 = vmatpush1.bf16.msra.mxu0 %v771_v49  ;;  %v220_v26 = vmul.f32 %v1210_v45, %v1210_v45 }
  0x42   :  { %757 = vmatprep.subr.bf16.mxu1 %v756_v27  ;;  %773 = vmatprep.subr.bf16.mxu0 %v806_v22  ;;  %v221_v27 = vadd.f32 %v219_v24, %v218_v23 }
  0x43   :  { %v222_v28 = vsel %vm70_vm1, %v220_v26, 0.0 }
  0x44   :  { %377 = vmatmul.mubr.f32.vlgmr.msra.gmra.mrb[0].mxu1 %v1171_v25  ;;  %v223_v29 = vadd.f32 %v222_v28, %v221_v27  ;;  %v597_v25 = vld [vmem:[%s1295_s5] ss:$0 sm:$0xff] }
  0x45   :  { %759 = vmatpush1.bf16.msra.mxu1 %v758_v36  ;;  %447 = vmatprep.mubr.f32.mxu1 %v808_v33  ;;  %v599_v33 = vld [vmem:[%s1296_s6] ss:$0 sm:$0xff] }
  0x46   :  { %761 = vmatprep.subr.bf16.mxu1 %v760_v37  ;;  %775 = vmatpush1.bf16.msra.mxu0 %v774_v52 }
  0x47   :  { %776 = vmatprep.subr.bf16.mxu0 %v806_v22  ;;  %224 = vadd.xlane.f32.xlu1 %v223_v29 }
  0x49   :  { %763 = vmatpush1.bf16.msra.mxu1 %v762_v44 }
  0x4a   :  { %778 = vmatpush1.bf16.msra.mxu0 %v777_v55 }
  0x4b   :  { %779 = vmatprep.subr.bf16.mxu0 %v806_v22 }
  0x4c   :  { %596 = vmatmul.mubr.msk.f32.vlgmr.msra.gmra.mrb[0].mxu1 %vm70_vm1, %v1210_v45 }
  0x4e   :  { %781 = vmatpush1.bf16.msra.mxu0 %v780_v58 }
  0x4f   :  { %782 = vmatprep.subr.bf16.mxu0 %v806_v22 }
  0x52   :  { %784 = vmatpush1.bf16.msra.mxu0 %v783_v61 }
  0x53   :  { %785 = vmatprep.subr.bf16.mxu0 %v806_v22 }
  0x56   :  { %787 = vmatpush1.bf16.msra.mxu0 %v786_v0 }
  0x57   :  { %788 = vmatprep.subr.bf16.mxu0 %v806_v22 }
  0x5a   :  { %790 = vmatpush1.bf16.msra.mxu0 %v789_v3 }
  0xd4   :  { %v225_v46 = vpop.xlane.xlu1 %224 }
 0x103   :  { %v635_v5 = vpop.f32.mrb[0].mxu0 }
 0x104   :  { %v636_v6 = vpop.f32.mrb[1].mxu0 }
 0x105   :  { %v637_v7 = vadd.f32 %v636_v6, %v635_v5 }
 0x10b   :  { %v210_v12 = vpop.f32.mrb[2].mxu0 }
 0x10c   :  { %v211_v13 = vadd.f32 %v637_v7, %v210_v12  ;;  %v653_v14 = vpop.f32.mrb[3].mxu0 }
 0x10e   :  { %v214_v36 = vmul.f32 %v211_v13, %v211_v13 }
 0x110   :  { %v215_v38 = vsel %vm70_vm1, %v214_v36, 0.0 }
 0x11f   :  { %v449_v17 = vpop.f32.mrb[0].mxu1 }
 0x120   :  { %v791_v18 = vadd.f32 %v449_v17, %v305_v15  ;;  %v451_v19 = vpop.f32.mrb[1].mxu1 }
 0x121   :  { %v792_v20 = vadd.f32 %v451_v19, %v309_v16 }
 0x122   :  { %v454_v22 = vmax.f32 %v791_v18, 0.0 }
 0x123   :  { %v455_v21 = vmax.f32 %v792_v20, 0.0 }
 0x125   :  { %598 = vmatprep.mubr.msk.f32.mxu0 %vm481_vm2, %v455_v21 }
 0x126   :  { %550 = vmatmul.mubr.f32.vlgmr.msra.gmra.mrb[4].mxu0 %v454_v22 }
 0x1f9   :  { %v551_v31 = vpop.f32.mrb[4].mxu0 }
 0x1fa   :  { %v552_v32 = vadd.f32 %v597_v25, %v551_v31  ;;  %v553_v41 = vpop.f32.mrb[5].mxu0 }
 0x1fc   :  { %v555_v34 = vmax.f32 %v552_v32, 0.0 }
 0x1fe   :  { %v563_v35 = vmul.f32 %v599_v33, %v555_v34 }
 0x200   :  { %v565_v37 = vsel %vm564_vm3, %v563_v35, 0.0 }
 0x201   :  { %566 = vadd.xlane.f32.xlu0 %v565_v37 }
 0x205   :  { %216 = vadd.xlane.f32.xlu0 %v215_v38 }
 0x28e   :  { %v567_v40 = vpop.xlane.xlu0 %566 }
 0x28f   :  { %v575_v42 = vadd.f32 %v600_v39, %v567_v40 }
 0x291   :  { %v601_v43 = vmul.f32 -1.442695, %v575_v42 }
 0x292   :  { %v217_v47 = vpop.xlane.xlu0 %216 }
 0x293   :  { %798 = vpow2.f32 %v601_v43  ;;  %v226_v48 = vsub.f32 %v217_v47, %v225_v46 }
 0x295   :  { %v227_v49 = vmul.f32 0.5, %v226_v48 }
 0x29d   :  { %v799_v44 = vpop.eup %798 }
 0x29e   :  { %v579_v45 = vadd.f32 1.0, %v799_v44 }
 0x2a0   :  { %800 = vrcp.f32 %v579_v45 }
 0x2aa   :  { %v801_v50 = vpop.eup %800 }
 0x2ab   :  { %v582_v51 = vadd.f32 %v801_v50, %v227_v49 }
 0x2ad   :  { %v602_v52 = vmul.f32 -1.442695, %v582_v51 }
 0x2af   :  { %802 = vpow2.f32 %v602_v52 }
 0x2b9   :  { %v803_v53 = vpop.eup %802 }
 0x2ba   :  { %v586_v54 = vadd.f32 1.0, %v803_v53 }
 0x2bc   :  { %804 = vrcp.f32 %v586_v54 }
 0x2c6   :  { %v805_v55 = vpop.eup %804 }
 0x2c7   :  { %590 = vst.msk [vmem:[%s1297_s8] sm:$0xff] %vm589_vm4, %v805_v55 }

</bundles_post_ra>
